<compile_context>
chip_gen: v7x
topology: tpu7x:2x2x1
jax: 0.10.0
libtpu: 0.0.40
codegen_flags: <defaults>
</compile_context>

<pallas_src>
import math

import jax
import jax.numpy as jnp
from jax.experimental import pallas as pl
from jax.experimental.pallas import tpu as pltpu

_MAX_TILE_BYTES = 8 * 1024 * 1024        # per-tile cap; 2 in + 2 out buffers = 32 MiB
_VMEM_LIMIT_BYTES = 48 * 1024 * 1024     # < 64 MiB (v7x physical), < 128 MiB (v5e/v6e)
_MEGACORE_SPLIT_BYTES = 2 * 1024 * 1024  # above this, force >=2 grid steps (v7x: 2 TCs)
_SUBLANE_ALIGN = 32                      # multiple of sublane packing for all dtypes


def _copy_kernel(x_ref, o_ref):
    # dropout with p=0 -> identity: pure copy, no cast, no multiply.
    o_ref[...] = x_ref[...]


def _materialized_copy(x):
    """Tiled Pallas identity copy (only used when a materialized copy is wanted)."""
    orig_shape = x.shape
    dtype = x.dtype
    total = math.prod(orig_shape) if orig_shape else 1
    itemsize = jnp.dtype(dtype).itemsize
    total_bytes = total * itemsize

    flat = x.reshape(-1)

    # Lane-dense column count that divides `total` exactly -> no pad/slice passes.
    cols = None
    for c in (1024, 512, 256, 128):
        if total % c == 0:
            cols = c
            break

    if cols is None:
        # Ragged size (not a multiple of 128 lanes): single full-extent block,
        # which is always layout-legal.
        # TODO(synk): very large ragged inputs would need a masked-tail split;
        # not reachable for the shapes this module is used with.
        out = pl.pallas_call(
            _copy_kernel,
            out_shape=jax.ShapeDtypeStruct((1, total), dtype),
            compiler_params=pltpu.CompilerParams(
                vmem_limit_bytes=_VMEM_LIMIT_BYTES),
        )(flat.reshape(1, total))
        return out.reshape(orig_shape)

    rows = total // cols
    row_bytes = cols * itemsize

    # Largest sublane-aligned row tile under the per-tile byte cap.
    max_tile_rows = max(
        _SUBLANE_ALIGN,
        (_MAX_TILE_BYTES // row_bytes) // _SUBLANE_ALIGN * _SUBLANE_ALIGN,
    )

    if rows <= max_tile_rows:
        if total_bytes > _MEGACORE_SPLIT_BYTES and rows >= 2 * _SUBLANE_ALIGN:
            # Mid-sized input: split into >=2 tiles so the "parallel" grid axis
            # shards across both TensorCores on v7x.
            tile_rows = max(
                _SUBLANE_ALIGN,
                ((rows + 1) // 2) // _SUBLANE_ALIGN * _SUBLANE_ALIGN,
            )
        else:
            tile_rows = rows  # single full-extent block: always layout-legal
    else:
        tile_rows = max_tile_rows

    grid = (pl.cdiv(rows, tile_rows),)  # partial last block handled by Pallas

    out2d = pl.pallas_call(
        _copy_kernel,
        out_shape=jax.ShapeDtypeStruct((rows, cols), dtype),
        grid_spec=pltpu.PrefetchScalarGridSpec(
            num_scalar_prefetch=0,
            grid=grid,
            in_specs=[pl.BlockSpec((tile_rows, cols), lambda i: (i, 0))],
            out_specs=pl.BlockSpec((tile_rows, cols), lambda i: (i, 0)),
        ),
        compiler_params=pltpu.CompilerParams(
            dimension_semantics=("parallel",),
            vmem_limit_bytes=_VMEM_LIMIT_BYTES,
        ),
    )(flat.reshape(rows, cols))

    return out2d.reshape(orig_shape)


def m1_forward(x, n=1, materialize=False):
    """JAX/Pallas equivalent of m1.forward.

    a1 = F.dropout(x, p=0)      -> exact identity (scale 1/(1-p) == 1, no mask)
    a2 = F.dropout(self.n, p=0) -> dropout on a Python int (the PyTorch
         jit_fail case); it has no tensor semantics and does not affect the
         returned value.
    # TODO(synk): dropout on the Python int `self.n` has no Pallas equivalent; omitted.

    Fast path (default): p=0 dropout needs no materialized copy, so return x
    directly (zero HBM traffic).  materialize=True runs the tiled Pallas copy
    kernel instead (used below to exercise the kernel on-device).
    """
    if not materialize:
        return x
    return _materialized_copy(x)


if __name__ == "__main__":
    key = jax.random.PRNGKey(0)
    # NCHW input, small shape consistent with a generic 4D tensor input.
    x = jax.random.normal(key, (2, 4, 16, 16), dtype=jnp.float32)

    # Production fast path: identity, no kernel launched.
    y_fast = m1_forward(x, n=1)

    # Pallas kernel path: materialized identity copy, exercised once here.
    y_kernel = jax.block_until_ready(m1_forward(x, n=1, materialize=True))

    assert y_kernel.shape == x.shape and y_kernel.dtype == x.dtype
    assert jnp.array_equal(y_kernel, x), "dropout(p=0) must be identity"
    assert jnp.array_equal(y_fast, x), "fast path must be identity"

    print("KERNEL_OK")
</pallas_src>

<mosaic_0001>
module attributes {stable_mosaic.version = 11 : i64} {
  func.func @_copy_kernel(%arg0: i32, %arg1: memref<2x1024xf32, #tpu.memory_space<vmem>>, %arg2: memref<2x1024xf32, #tpu.memory_space<vmem>>) attributes {dimension_semantics = [#tpu.dimension_semantics<parallel>], iteration_bounds = array<i64: 1>, scalar_prefetch = 0 : i64, scratch_operands = 0 : i64, tpu.core_type = #tpu.core_type<tc>, window_params = [{transform_indices = @transform_0, window_bounds = array<i64: 2, 1024>}, {transform_indices = @transform_1, window_bounds = array<i64: 2, 1024>}]} {
    %c0 = arith.constant 0 : index
    %c0_0 = arith.constant 0 : index
    %0 = vector.load %arg1[%c0, %c0_0] : memref<2x1024xf32, #tpu.memory_space<vmem>>, vector<2x1024xf32>
    %c0_1 = arith.constant 0 : index
    %c0_2 = arith.constant 0 : index
    %1 = vector.load %arg2[%c0_1, %c0_2] : memref<2x1024xf32, #tpu.memory_space<vmem>>, vector<2x1024xf32>
    tpu.vector_store %arg2[%c0_1, %c0_2], %0 {strides = array<i32>} : memref<2x1024xf32, #tpu.memory_space<vmem>>, vector<2x1024xf32>,
    return
  }
  func.func @transform_0(%arg0: i32) -> (i32, i32) {
    %c0_i32 = arith.constant 0 : i32
    %c0_i32_0 = arith.constant 0 : i32
    return %arg0, %c0_i32 : i32, i32
  }
  func.func @transform_1(%arg0: i32) -> (i32, i32) {
    %c0_i32 = arith.constant 0 : i32
    %c0_i32_0 = arith.constant 0 : i32
    return %arg0, %c0_i32 : i32, i32
  }
}

</mosaic_0001>

<bundles_post_ra>
// kernel: tpu_custom_call.1
= control target key start
LH: loop header
LB: loop body
LE: loop exit
PB: predicated region body
PF: predicated region fallthrough
CT: control target
= control target key end

     0   :  { %6 = vsyncpa [#allocation3], 0  ;;  %s126_s0 = inlined_call_operand.hbm [shape: f32[2,1024], index: 0, kind: input, shape index: {}]   ;;  %s127_s1 = inlined_call_operand.hbm [shape: f32[2,1024], index: 1, kind: output, shape index: {}]  }
   0x1   :  { %7 = vsyncpa [#allocation4], 0  ;;  %s90_s6 = smov [#allocation2]   ;;  %s42_s10 = scalar_lea.hbm %s126_s0, 256 }
   0x2   :  { %s14_s7 = sshll.u32 %s90_s6, 4  ;;  %p43_p0 = scmp.ne.s32.totalorder %s126_s0, %s42_s10  ;;  %s15_s7 = int_to_ptr.vmem [resolvable:$true] %s14_s7 }
   0x3   :  { %p46_p1 = scmp.lt.u32.totalorder %s42_s10, %s126_s0 }
   0x5   :  { %p48_p2 = pnand %p46_p1, %p43_p0 }
   0x7   :  { %51 = shalt.err (!%p48_p2)
}
   0x8   :  { %s52_s15 = scalar_lea.vmem %s15_s7, 256  ;;  %p57_p4 = scmp.lt.s32.totalorder %s15_s7, %s15_s7 }
   0x9   :  { %p53_p3 = scmp.ne.s32.totalorder %s15_s7, %s52_s15  ;;  %p58_p5 = scmp.lt.s32.totalorder %s52_s15, %s52_s15 }
   0xb   :  { %p59_p6 = por %p58_p5, %p57_p4 }
   0xd   :  { %p60_p7 = pnand %p59_p6, %p53_p3 }
   0xf   :  { %63 = shalt.err (!%p60_p7)
}
  0x10   :  { %17 = dma.hbm_to_vmem [thread:$0]  %s126_s0, 256, %s15_s7, [#allocation3]  }
  0x11   :  { %86 = dma.done.wait [#allocation3], 256  }
  0x12   :  { %87 = vsyncadd [#allocation3], 4294967040  ;;  %s91_s18 = smov [#allocation5]   ;;  %v21_v0 = vld [vmem:[#allocation2] sm:$0xff]  ;;  %v22_v1 = vld [vmem:[#allocation2 + $0x8] sm:$0xff] }
  0x13   :  { %s31_s19 = sshll.u32 %s91_s18, 4  ;;  %23 = vst [vmem:[#allocation5] sm:$0xff] %v21_v0  ;;  %24 = vst [vmem:[#allocation5 + $0x8] sm:$0xff] %v22_v1  ;;  %s32_s19 = int_to_ptr.vmem [resolvable:$true] %s31_s19 }
  0x14   :  { %s64_s20 = scalar_lea.vmem %s32_s19, 256  ;;  %p69_p9 = scmp.lt.s32.totalorder %s32_s19, %s32_s19 }
  0x15   :  { %p65_p8 = scmp.ne.s32.totalorder %s32_s19, %s64_s20  ;;  %p70_p10 = scmp.lt.s32.totalorder %s64_s20, %s64_s20 }
  0x17   :  { %p71_p11 = por %p70_p10, %p69_p9 }
  0x19   :  { %p72_p12 = pnand %p71_p11, %p65_p8 }
  0x1b   :  { %75 = shalt.err (!%p72_p12)
}
  0x1c   :  { %s76_s0 = scalar_lea.hbm %s127_s1, 256 }
  0x1d   :  { %p77_p13 = scmp.ne.s32.totalorder %s127_s1, %s76_s0  ;;  %p80_p0 = scmp.lt.u32.totalorder %s76_s0, %s127_s1 }
  0x1f   :  { %p82_p1 = pnand %p80_p0, %p77_p13 }
  0x21   :  { %85 = shalt.err (!%p82_p1)
}
  0x22   :  { %34 = dma.vmem_to_hbm [thread:$0]  %s32_s19, 256, %s127_s1, [#allocation4]  }
  0x23   :  { %88 = dma.done.wait [#allocation4], 256  }
  0x24   :  { %89 = vsyncadd [#allocation4], 4294967040 }
  0x25   :  { %38 = vsyncpa [#allocation3], 1 }
  0x26   :  { %39 = vsyncpa [#allocation4], 1 }

</bundles_post_ra>
